<compile_context>
chip_gen: v5e
topology: v5e:2x2
jax: 0.10.0
libtpu: 0.0.40
codegen_flags: <defaults>
</compile_context>

<pallas_src>
import jax
import jax.numpy as jnp
from jax.experimental import pallas as pl
from jax.experimental.pallas import tpu as pltpu


def _round_up(n, m):
    return ((n + m - 1) // m) * m


def _sigmoid_mlp_kernel(x_ref, w1_ref, b1_ref, w2_ref, b2_ref, o_ref):
    # In-kernel cast of the f32 input tile to the matmul dtype (free under MXU).
    x = x_ref[...].astype(w1_ref.dtype)
    # First linear: (TILE_B, Din) @ (Din, Hp) -> f32 accumulate, + f32 bias.
    h = jnp.dot(x, w1_ref[...], preferred_element_type=jnp.float32)
    h = h + b1_ref[...]                      # (1, Hp) broadcasts over rows
    # LeakyReLU with PyTorch default negative_slope = 0.01.
    h = jnp.where(h >= 0, h, 0.01 * h)
    # Second linear: (TILE_B, Hp) @ (Hp, Dout) -> f32 accumulate, + f32 bias.
    y = jnp.dot(h.astype(w2_ref.dtype), w2_ref[...],
                preferred_element_type=jnp.float32)
    y = y + b2_ref[...]
    # Sigmoid: exp on EUP; approx reciprocal also EUP -> epilogue off the VALU.
    e = jnp.exp(-y)
    o_ref[...] = pl.reciprocal(1.0 + e, approx=True).astype(o_ref.dtype)
    # NOTE: output last dim (Dout) is tiny -> masked stores; lane-dense output
    # packing only matters if a profile shows exposed writeback (it doesn't here).


def _resident_spec(block_shape, index_map):
    """Constant-index_map operand: single-buffered (no pointless double buffer)."""
    try:
        return pl.BlockSpec(block_shape, index_map, pipeline_mode=pl.Buffered(1))
    except TypeError:  # older jax without pipeline_mode kwarg
        return pl.BlockSpec(block_shape, index_map)


def _tensorcores_per_chip():
    try:
        kind = jax.devices()[0].device_kind.lower()
    except Exception:
        return 1
    # v7x (and v4/v5p-class megacore parts) expose 2 TensorCores per chip.
    if "v7" in kind or "7x" in kind or "v4" in kind or "v5p" in kind:
        return 2
    return 1


def _choose_tile_b(B, tile_b, num_cores):
    if B <= 256:
        return B                      # one step: step overhead dominates tiny batches
    tb = min(tile_b, B)
    if num_cores >= 2:
        # Keep >= 2 (even) grid steps so both TensorCores get work and the
        # x/out DMAs actually pipeline (i+1 prefetch).
        tb = min(tb, _round_up(pl.cdiv(B, 2), 8))
    tb = _round_up(tb, 8)             # sublane-aligned block (unless full batch)
    return B if tb >= B else tb


def _vmem_limit_bytes(TILE_B, Din, Hp, Dout, w_itemsize):
    x_tile = TILE_B * Din * 4              # f32 input tile
    out_tile = TILE_B * Dout * 4           # f32 output tile
    weights = (Din * Hp + Hp * Dout) * w_itemsize + (Hp + Dout) * 4  # single-buffered
    h_interm = TILE_B * Hp * 4             # f32 intermediate (compiler-managed)
    need = 2 * (x_tile + out_tile) + weights + h_interm
    # Generous headroom, clamped to a range safe on v5e/v6e (128 MiB) and v7x (64 MiB).
    return int(min(max(2 * need + (4 << 20), 32 << 20), 64 << 20))


def prepare_params(w1, b1, w2, b2, *, matmul_dtype=jnp.bfloat16):
    """One-time (init-time) weight prep: pad hidden dim to a multiple of 128 and
    cast matmul operands. Padding is a mathematical no-op: padded h columns are
    LeakyReLU(0 + 0) = 0 and padded w2 rows are 0. Weights are stored
    (in_features, out_features), i.e. already transposed vs. PyTorch."""
    Din, H = w1.shape
    Dout = w2.shape[1]
    Hp = _round_up(H, 128)
    if Hp != H:
        w1 = jnp.pad(w1, ((0, 0), (0, Hp - H)))
        b1 = jnp.pad(b1, ((0, Hp - H),))
        w2 = jnp.pad(w2, ((0, Hp - H), (0, 0)))
    w1 = w1.astype(matmul_dtype)
    w2 = w2.astype(matmul_dtype)
    b1 = b1.reshape(1, Hp).astype(jnp.float32)
    b2 = b2.reshape(1, Dout).astype(jnp.float32)
    return w1, b1, w2, b2


def sigmoid_mlp(x, w1, b1, w2, b2, *, tile_b=1024):
    """x: (B, Din) f32; (w1, b1, w2, b2) as returned by prepare_params().
    Computes sigmoid(leaky_relu(x @ w1 + b1) @ w2 + b2)."""
    B, Din = x.shape
    assert w1.shape[0] == Din, "w1 must be (Din, Hp)"
    Hp = w1.shape[1]
    Dout = w2.shape[1]

    num_cores = _tensorcores_per_chip()
    TILE_B = _choose_tile_b(B, tile_b, num_cores)
    grid = (pl.cdiv(B, TILE_B),)

    w_item = jnp.dtype(w1.dtype).itemsize
    cost = pl.CostEstimate(
        flops=2 * B * (Din * Hp + Hp * Dout),
        transcendentals=2 * B * Dout,            # exp + approx reciprocal per elem
        bytes_accessed=(B * Din * 4               # x (f32, streamed)
                        + Din * Hp * w_item       # w1 (read once, resident)
                        + Hp * Dout * w_item      # w2
                        + (Hp + Dout) * 4         # biases (f32)
                        + B * Dout * 4),          # output (f32)
    )

    return pl.pallas_call(
        _sigmoid_mlp_kernel,
        out_shape=jax.ShapeDtypeStruct((B, Dout), jnp.float32),
        grid=grid,
        in_specs=[
            pl.BlockSpec((TILE_B, Din), lambda i: (i, 0)),   # streamed per tile
            _resident_spec((Din, Hp), lambda i: (0, 0)),     # resident weights
            _resident_spec((1, Hp), lambda i: (0, 0)),
            _resident_spec((Hp, Dout), lambda i: (0, 0)),
            _resident_spec((1, Dout), lambda i: (0, 0)),
        ],
        out_specs=pl.BlockSpec((TILE_B, Dout), lambda i: (i, 0)),
        compiler_params=pltpu.CompilerParams(
            dimension_semantics=("parallel",),   # shards batch grid across 2 TCs (v7x)
            vmem_limit_bytes=_vmem_limit_bytes(TILE_B, Din, Hp, Dout, w_item),
        ),
        cost_estimate=cost,
    )(x, w1, b1, w2, b2)


def init_params(key, input_dim, hidden_dim, output_dim):
    """Deterministic init mimicking PyTorch nn.Linear (uniform +/- 1/sqrt(fan_in)).
    Weights stored transposed: (in_features, out_features)."""
    k1, k2, k3, k4 = jax.random.split(key, 4)
    bound1 = 1.0 / jnp.sqrt(input_dim)
    bound2 = 1.0 / jnp.sqrt(hidden_dim)
    w1 = jax.random.uniform(k1, (input_dim, hidden_dim), jnp.float32, -bound1, bound1)
    b1 = jax.random.uniform(k2, (hidden_dim,), jnp.float32, -bound1, bound1)
    w2 = jax.random.uniform(k3, (hidden_dim, output_dim), jnp.float32, -bound2, bound2)
    b2 = jax.random.uniform(k4, (output_dim,), jnp.float32, -bound2, bound2)
    return w1, b1, w2, b2


def reference(x, w1, b1, w2, b2):
    h = x @ w1 + b1
    h = jnp.where(h >= 0, h, 0.01 * h)
    y = h @ w2 + b2
    return jax.nn.sigmoid(y)


if __name__ == "__main__":
    key = jax.random.PRNGKey(0)
    kx, kp, kx2 = jax.random.split(key, 3)

    # Small shapes consistent with the module spec.
    batch, input_dim, hidden_dim, output_dim = 8, 16, 32, 8
    x = jax.random.normal(kx, (batch, input_dim), jnp.float32)
    w1, b1, w2, b2 = init_params(kp, input_dim, hidden_dim, output_dim)

    # One-time weight prep (padding/casting hoisted out of the per-call path).
    params = prepare_params(w1, b1, w2, b2)
    params = jax.tree_util.tree_map(jax.block_until_ready, params)

    out = sigmoid_mlp(x, *params)
    out = jax.block_until_ready(out)
    ref = reference(x, w1, b1, w2, b2)
    assert out.shape == (batch, output_dim)
    # bf16 matmul operands + approx reciprocal -> looser tolerance than pure f32.
    assert jnp.allclose(out, ref, atol=2e-2, rtol=2e-2)

    # Exercise the multi-step batch grid (resident single-buffered weights,
    # pipelined x/out tiles; >= 2 even steps on 2-TensorCore chips).
    big_batch = 2048
    x_big = jax.random.normal(kx2, (big_batch, input_dim), jnp.float32)
    out_big = sigmoid_mlp(x_big, *params)
    out_big = jax.block_until_ready(out_big)
    ref_big = reference(x_big, w1, b1, w2, b2)
    assert out_big.shape == (big_batch, output_dim)
    assert jnp.allclose(out_big, ref_big, atol=2e-2, rtol=2e-2)

    print("KERNEL_OK")
</pallas_src>

<mosaic_0001>
module attributes {stable_mosaic.version = 11 : i64} {
  func.func @_sigmoid_mlp_kernel(%arg0: i32, %arg1: memref<8x16xf32, #tpu.memory_space<vmem>>, %arg2: memref<16x128xbf16, #tpu.memory_space<vmem>>, %arg3: memref<1x128xf32, #tpu.memory_space<vmem>>, %arg4: memref<128x8xbf16, #tpu.memory_space<vmem>>, %arg5: memref<1x8xf32, #tpu.memory_space<vmem>>, %arg6: memref<8x8xf32, #tpu.memory_space<vmem>>) attributes {dimension_semantics = [#tpu.dimension_semantics<parallel>], iteration_bounds = array<i64: 1>, scalar_prefetch = 0 : i64, scratch_operands = 0 : i64, tpu.core_type = #tpu.core_type<tc>, window_params = [{transform_indices = @transform_0, window_bounds = array<i64: 8, 16>}, {pipeline_mode = #tpu.pipeline_mode<synchronous>, transform_indices = @transform_1, window_bounds = array<i64: 16, 128>}, {pipeline_mode = #tpu.pipeline_mode<synchronous>, transform_indices = @transform_2, window_bounds = array<i64: 1, 128>}, {pipeline_mode = #tpu.pipeline_mode<synchronous>, transform_indices = @transform_3, window_bounds = array<i64: 128, 8>}, {pipeline_mode = #tpu.pipeline_mode<synchronous>, transform_indices = @transform_4, window_bounds = array<i64: 1, 8>}, {transform_indices = @transform_5, window_bounds = array<i64: 8, 8>}]} {
    %c0 = arith.constant 0 : index
    %c0_0 = arith.constant 0 : index
    %0 = vector.load %arg1[%c0, %c0_0] : memref<8x16xf32, #tpu.memory_space<vmem>>, vector<8x16xf32>
    %1 = arith.truncf %0 : vector<8x16xf32> to vector<8x16xbf16>
    %c0_1 = arith.constant 0 : index
    %c0_2 = arith.constant 0 : index
    %2 = vector.load %arg2[%c0_1, %c0_2] : memref<16x128xbf16, #tpu.memory_space<vmem>>, vector<16x128xbf16>
    %cst = arith.constant dense<0.000000e+00> : vector<8x128xf32>
    %3 = tpu.matmul %1, %2, %cst {dimension_numbers = #tpu.dot_dimension_numbers<[1], [0], [0], [1], [0, 0, 1, 1], [], []>} : vector<8x16xbf16>, vector<16x128xbf16>, vector<8x128xf32> -> vector<8x128xf32>
    %c0_3 = arith.constant 0 : index
    %c0_4 = arith.constant 0 : index
    %4 = vector.load %arg3[%c0_3, %c0_4] : memref<1x128xf32, #tpu.memory_space<vmem>>, vector<1x128xf32>
    %5 = vector.broadcast %4 : vector<1x128xf32> to vector<8x128xf32>
    %6 = arith.addf %3, %5 : vector<8x128xf32>
    %cst_5 = arith.constant 0.000000e+00 : f32
    %7 = vector.broadcast %cst_5 : f32 to vector<8x128xf32>
    %8 = arith.cmpf oge, %6, %7 : vector<8x128xf32>
    %cst_6 = arith.constant 0.00999999977 : f32
    %9 = vector.broadcast %cst_6 : f32 to vector<8x128xf32>
    %10 = arith.mulf %9, %6 : vector<8x128xf32>
    %11 = arith.select %8, %6, %10 : vector<8x128xi1>, vector<8x128xf32>
    %12 = arith.truncf %11 : vector<8x128xf32> to vector<8x128xbf16>
    %c0_7 = arith.constant 0 : index
    %c0_8 = arith.constant 0 : index
    %13 = vector.load %arg4[%c0_7, %c0_8] : memref<128x8xbf16, #tpu.memory_space<vmem>>, vector<128x8xbf16>
    %cst_9 = arith.constant dense<0.000000e+00> : vector<8x8xf32>
    %14 = tpu.matmul %12, %13, %cst_9 {dimension_numbers = #tpu.dot_dimension_numbers<[1], [0], [0], [1], [0, 0, 1, 1], [], []>} : vector<8x128xbf16>, vector<128x8xbf16>, vector<8x8xf32> -> vector<8x8xf32>
    %c0_10 = arith.constant 0 : index
    %c0_11 = arith.constant 0 : index
    %15 = vector.load %arg5[%c0_10, %c0_11] : memref<1x8xf32, #tpu.memory_space<vmem>>, vector<1x8xf32>
    %16 = vector.broadcast %15 : vector<1x8xf32> to vector<8x8xf32>
    %17 = arith.addf %14, %16 : vector<8x8xf32>
    %cst_12 = arith.constant 0.000000e+00 : f32
    %18 = vector.broadcast %cst_12 : f32 to vector<8x8xf32>
    %19 = arith.subf %18, %17 : vector<8x8xf32>
    %20 = math.exp %19 : vector<8x8xf32>
    %cst_13 = arith.constant 1.000000e+00 : f32
    %21 = vector.broadcast %cst_13 : f32 to vector<8x8xf32>
    %22 = arith.addf %21, %20 : vector<8x8xf32>
    %23 = tpu.reciprocal %22 {approx = true} : vector<8x8xf32> -> vector<8x8xf32>
    %c0_14 = arith.constant 0 : index
    %c0_15 = arith.constant 0 : index
    %24 = vector.load %arg6[%c0_14, %c0_15] : memref<8x8xf32, #tpu.memory_space<vmem>>, vector<8x8xf32>
    tpu.vector_store %arg6[%c0_14, %c0_15], %23 {strides = array<i32>} : memref<8x8xf32, #tpu.memory_space<vmem>>, vector<8x8xf32>,
    return
  }
  func.func @transform_0(%arg0: i32) -> (i32, i32) {
    %c0_i32 = arith.constant 0 : i32
    %c0_i32_0 = arith.constant 0 : i32
    return %arg0, %c0_i32 : i32, i32
  }
  func.func @transform_1(%arg0: i32) -> (i32, i32) {
    %c0_i32 = arith.constant 0 : i32
    %c0_i32_0 = arith.constant 0 : i32
    %c0_i32_1 = arith.constant 0 : i32
    return %c0_i32, %c0_i32_0 : i32, i32
  }
  func.func @transform_2(%arg0: i32) -> (i32, i32) {
    %c0_i32 = arith.constant 0 : i32
    %c0_i32_0 = arith.constant 0 : i32
    %c0_i32_1 = arith.constant 0 : i32
    return %c0_i32, %c0_i32_0 : i32, i32
  }
  func.func @transform_3(%arg0: i32) -> (i32, i32) {
    %c0_i32 = arith.constant 0 : i32
    %c0_i32_0 = arith.constant 0 : i32
    %c0_i32_1 = arith.constant 0 : i32
    return %c0_i32, %c0_i32_0 : i32, i32
  }
  func.func @transform_4(%arg0: i32) -> (i32, i32) {
    %c0_i32 = arith.constant 0 : i32
    %c0_i32_0 = arith.constant 0 : i32
    %c0_i32_1 = arith.constant 0 : i32
    return %c0_i32, %c0_i32_0 : i32, i32
  }
  func.func @transform_5(%arg0: i32) -> (i32, i32) {
    %c0_i32 = arith.constant 0 : i32
    %c0_i32_0 = arith.constant 0 : i32
    return %arg0, %c0_i32 : i32, i32
  }
}

</mosaic_0001>

<bundles_post_ra>
// kernel: tpu_custom_call.1
= control target key start
LH: loop header
LB: loop body
LE: loop exit
PB: predicated region body
PF: predicated region fallthrough
CT: control target
= control target key end

     0   :  { %vm36_vm0 = vcmask 130048   ;;  %s310_s0 = inlined_call_operand.vmem [shape: f32[8,16], index: 0, kind: input, shape index: {}]   ;;  %s311_s1 = inlined_call_operand.vmem [shape: bf16[16,128], index: 1, kind: input, shape index: {}]   ;;  %s312_s2 = inlined_call_operand.vmem [shape: f32[1,128], index: 2, kind: input, shape index: {}]   ;;  %s313_s3 = inlined_call_operand.vmem [shape: bf16[128,8], index: 3, kind: input, shape index: {}]   ;;  %s314_s4 = inlined_call_operand.vmem [shape: f32[1,8], index: 4, kind: input, shape index: {}]   ;;  %s315_s5 = inlined_call_operand.hbm [shape: f32[8,8], index: 5, kind: output, shape index: {}]  }
   0x1   :  { %v198_v0 = vld [vmem:[%s311_s1] sm:$0xff]  ;;  %v206_v2 = vld [vmem:[%s313_s3 + $0x38] sm:$0xff]  ;;  %v205_v4 = vld [vmem:[%s313_s3 + $0x30] sm:$0xff] }
   0x2   :  { %v22_v1 = vld [vmem:[%s310_s0] sm:$0xff]  ;;  %47 = vmatpush.bf16.msra.mxu0 %v198_v0  ;;  %125 = vmatpush.bf16.msra.mxu1 %v206_v2 }
   0x3   :  { %v23_v3 = vpack.c.bf16 %v22_v1, %v22_v1 }
   0x4   :  { %10 = vsyncpa [#allocation3], 0  ;;  %v204_v5 = vld [vmem:[%s313_s3 + $0x28] sm:$0xff]  ;;  %v203_v6 = vld [vmem:[%s313_s3 + $0x20] sm:$0xff]  ;;  %s152_s17 = sshll.u32 %s315_s5, 4  ;;  %vm143_vm2 = vcmask 64512   ;;  %s153_s17 = int_to_ptr.hbm [resolvable:$true] %s152_s17 }
   0x5   :  { %165 = vmatmul.msk.bf16.vlgmr.msra.gmra.mxu0 %vm36_vm0, %v23_v3  ;;  %v202_v7 = vld [vmem:[%s313_s3 + $0x18] sm:$0xff]  ;;  %v201_v8 = vld [vmem:[%s313_s3 + $0x10] sm:$0xff]  ;;  %v200_v9 = vld [vmem:[%s313_s3 + $0x8] sm:$0xff] }
   0x6   :  { %126 = vmatpush.bf16.msra.mxu1 %v205_v4  ;;  %v199_v10 = vld [vmem:[%s313_s3] sm:$0xff] }
   0x7   :  { %v208_v11 = vld [vmem:[%s312_s2] ss:$0 sm:$0xff]  ;;  %s240_s2 = smov [#allocation2]  }
   0x8   :  { %v209_v18 = vld [vmem:[%s314_s4] ss:$0 sm:$0xff]  ;;  %s150_s3 = sshll.u32 %s240_s2, 4  ;;  %s151_s3 = int_to_ptr.vmem [resolvable:$true] %s150_s3 }
   0xa   :  { %127 = vmatpush.bf16.msra.mxu1 %v204_v5 }
   0xe   :  { %128 = vmatpush.bf16.msra.mxu1 %v203_v6 }
  0x12   :  { %129 = vmatpush.bf16.msra.mxu1 %v202_v7 }
  0x16   :  { %130 = vmatpush.bf16.msra.mxu1 %v201_v8 }
  0x1a   :  { %131 = vmatpush.bf16.msra.mxu1 %v200_v9 }
  0x1e   :  { %132 = vmatpush.bf16.msra.mxu1 %v199_v10 }
  0x82   :  { %v49_v12 = vpop.f32.mrf.mxu0 }
  0x83   :  { %v50_v13 = vadd.f32 %v208_v11, %v49_v12 }
  0x85   :  { %v54_v14 = vmul.f32 0.01, %v50_v13  ;;  %vm53_vm1 = vcmp.ge.f32.partialorder %v50_v13, 0.0 }
  0x87   :  { %v55_v15 = vsel %vm53_vm1, %v50_v13, %v54_v14 }
  0x88   :  { %v56_v16 = vpack.c.bf16 %v55_v15, %v55_v15 }
  0x8a   :  { %v51_v17 = vpop.f32.mrf.mxu0  ;;  %133 = vmatmul.bf16.vlgmr.msra.gmra.mxu1 %v56_v16 }
 0x107   :  { %v134_v19 = vpop.f32.mrf.mxu1 }
 0x108   :  { %v135_v20 = vadd.f32 %v209_v18, %v134_v19 }
 0x10a   :  { %v138_v21 = vsub.f32 0.0, %v135_v20 }
 0x10c   :  { %v139_v22 = vmul.f32 1.442695, %v138_v21 }
 0x10e   :  { %210 = vpow2.f32 %v139_v22 }
 0x10f   :  { %v136_v23 = vpop.f32.mrf.mxu1 }
 0x114   :  { %v211_v24 = vpop.eup %210 }
 0x115   :  { %v141_v25 = vadd.f32 1.0, %v211_v24 }
 0x117   :  { %212 = vrcp.f32 %v141_v25 }
 0x11d   :  { %v213_v26 = vpop.eup %212 }
 0x11e   :  { %144 = vst.msk [vmem:[#allocation2] sm:$0xff] %vm143_vm2, %v213_v26 }
 0x11f   :  { %155 = dma.vmem_to_hbm [thread:$0]  %s151_s3, 128, %s153_s17, [#allocation3]  }
 0x120   :  { %238 = dma.done.wait [#allocation3], 128  }
 0x121   :  { %239 = vsyncadd [#allocation3], 4294967168 }
 0x122   :  { %160 = vsyncpa [#allocation3], 1 }

</bundles_post_ra>
